<compile_context>
chip_gen: v5e
topology: v5e:2x2
jax: 0.10.0
libtpu: 0.0.40
codegen_flags: <defaults>
</compile_context>

<pallas_src>
import math

import numpy as np
import jax
import jax.numpy as jnp
from jax.experimental import pallas as pl
from jax.experimental.pallas import tpu as pltpu


# ----------------------------------------------------------------------------
# Host-side (numpy) construction of the fused linear maps.
# ----------------------------------------------------------------------------
def _bilinear_matrix(out_size: int, in_size: int) -> np.ndarray:
    """Dense (out, in) matrix matching F.interpolate(mode='bilinear',
    align_corners=False) along one axis."""
    scale = in_size / out_size
    dst = np.arange(out_size, dtype=np.float64)
    src = scale * (dst + 0.5) - 0.5
    src = np.maximum(src, 0.0)                      # PyTorch clamps negatives
    i0 = np.minimum(np.floor(src).astype(np.int64), in_size - 1)
    i1 = np.minimum(i0 + 1, in_size - 1)
    l1 = src - i0.astype(np.float64)
    l0 = 1.0 - l1
    M = np.zeros((out_size, in_size), dtype=np.float32)
    rows = np.arange(out_size)
    np.add.at(M, (rows, i0), l0.astype(np.float32))
    np.add.at(M, (rows, i1), l1.astype(np.float32))
    return M


def _pad_matrix(before: int, after: int, size: int) -> np.ndarray:
    """Zero-padding along one axis as a (size+before+after, size) matrix."""
    M = np.zeros((size + before + after, size), dtype=np.float32)
    M[before:before + size, :] = np.eye(size, dtype=np.float32)
    return M


# ----------------------------------------------------------------------------
# Pallas kernel: one grid step resizes bB images at once.
# ----------------------------------------------------------------------------
def _resize_kernel(x_ref, mwt_ref, mhb_ref, o_ref):
    # x_ref:   (bB*H, W)     bB images, rows flattened (image-major)
    # mwt_ref: (W, 32)       fused width-interpolation matrix, transposed
    # mhb_ref: (bB, 32, H)   fused height matrix, pre-broadcast over the block
    # o_ref:   (bB, 32, 32)
    bB = o_ref.shape[0]
    H = mhb_ref.shape[2]

    # Width contraction as one big-M matmul: M = bB*H fills the MXU pipeline.
    t1 = jnp.dot(x_ref[...], mwt_ref[...],
                 preferred_element_type=jnp.float32)          # (bB*H, 32)
    t1 = t1.reshape(bB, H, 32)

    # Height contraction as a standard batched matmul (flash-attention pattern).
    o_ref[...] = jnp.einsum('boh,bhk->bok', mhb_ref[...], t1,
                            preferred_element_type=jnp.float32)  # (bB, 32, 32)


def _pick_batch_block(B: int, H: int, W: int, budget_bytes: int = 12 << 20) -> int:
    """Images per grid step: biggest block that fits a conservative VMEM budget
    (double-buffered input + broadcast height matrix + output), while keeping
    >= 2 grid steps when possible so v7x megacore can shard the batch axis."""
    per_image = 4 * (H * W + 32 * H + 32 * 32)       # f32 bytes per image in VMEM
    bB = max(1, budget_bytes // (2 * per_image))     # 2x for double-buffering
    bB = min(bB, B)
    if bB >= B and B > 1:
        bB = pl.cdiv(B, 2)                           # keep the grid >= 2 steps
    # First block dim of the 2-D input view is bB*H; keep it a multiple of 8 sublanes.
    need = 8 // math.gcd(H, 8)
    bB = max(need, ((bB + need - 1) // need) * need)
    return int(bB)


def randomfront(x: jax.Array, key: jax.Array, epsilon: float = 8.0 / 255.0) -> jax.Array:
    """Pallas equivalent of Randomfront.forward. x is NCHW float32."""
    del epsilon  # stored but unused by the reference forward pass
    N, C, H, W = x.shape

    # One randint call + one device->host transfer (instead of six round-trips).
    minv = jnp.array([32, 32, 0, 0, 0, 0], dtype=jnp.int32)
    maxv = jnp.array([36, 36, 3, 3, 3, 3], dtype=jnp.int32)
    draws = np.asarray(jax.device_get(jax.random.randint(key, (6,), minv, maxv)))
    H1, W1, p_left, p_right, p_top, p_bottom = (int(v) for v in draws)

    # Fuse resize(H->H1) -> pad -> resize(->32) into one (32, H) matrix (ditto W).
    A1_h = _bilinear_matrix(H1, H)
    A1_w = _bilinear_matrix(W1, W)
    P_h = _pad_matrix(p_top, p_bottom, H1)
    P_w = _pad_matrix(p_left, p_right, W1)
    A2_h = _bilinear_matrix(32, H1 + p_top + p_bottom)
    A2_w = _bilinear_matrix(32, W1 + p_left + p_right)
    M_h = A2_h @ P_h @ A1_h                                   # (32, H)
    M_wT = jnp.asarray((A2_w @ P_w @ A1_w).T)                 # (W, 32)

    B = N * C
    bB = _pick_batch_block(B, H, W)
    Bp = pl.cdiv(B, bB) * bB                                  # pad batch to a multiple of bB
    grid = Bp // bB

    # Flatten NCHW -> (B*H, W): contiguity-preserving, no data movement.
    xb2 = x.astype(jnp.float32).reshape(B * H, W)
    if Bp > B:
        xb2 = jnp.pad(xb2, ((0, (Bp - B) * H), (0, 0)))

    # Pre-broadcast the height matrix over the block so the in-kernel second
    # matmul is a plain batched dot_general; constant index_map -> DMA'd once.
    M_hb = jnp.broadcast_to(jnp.asarray(M_h), (bB, 32, H))

    flops = 2 * Bp * 32 * H * (W + 32)
    bytes_accessed = 4 * (Bp * H * W + Bp * 32 * 32 + W * 32 + bB * 32 * H)

    out = pl.pallas_call(
        _resize_kernel,
        out_shape=jax.ShapeDtypeStruct((Bp, 32, 32), jnp.float32),
        grid_spec=pltpu.PrefetchScalarGridSpec(
            num_scalar_prefetch=0,
            grid=(grid,),
            in_specs=[
                pl.BlockSpec((bB * H, W), lambda i: (i, 0)),       # bB images / step
                pl.BlockSpec((W, 32), lambda i: (0, 0)),           # width matrix (resident)
                pl.BlockSpec((bB, 32, H), lambda i: (0, 0, 0)),    # height matrix (resident)
            ],
            out_specs=pl.BlockSpec((bB, 32, 32), lambda i: (i, 0, 0)),
        ),
        compiler_params=pltpu.CompilerParams(
            dimension_semantics=("parallel",)),
        cost_estimate=pl.CostEstimate(
            flops=flops, transcendentals=0, bytes_accessed=bytes_accessed),
    )(xb2, M_wT, M_hb)

    return out[:B].reshape(N, C, 32, 32)


if __name__ == "__main__":
    key = jax.random.PRNGKey(0)
    kx, kr = jax.random.split(key)
    x = jax.random.uniform(kx, (2, 4, 16, 16), dtype=jnp.float32)   # NCHW
    y = randomfront(x, kr)
    jax.block_until_ready(y)
    assert y.shape == (2, 4, 32, 32) and y.dtype == jnp.float32
    print("KERNEL_OK")
</pallas_src>

<mosaic_0001>
module attributes {stable_mosaic.version = 11 : i64} {
  func.func @_resize_kernel(%arg0: i32, %arg1: memref<64x16xf32, #tpu.memory_space<vmem>>, %arg2: memref<16x32xf32, #tpu.memory_space<vmem>>, %arg3: memref<4x32x16xf32, #tpu.memory_space<vmem>>, %arg4: memref<4x32x32xf32, #tpu.memory_space<vmem>>) attributes {dimension_semantics = [#tpu.dimension_semantics<parallel>], iteration_bounds = array<i64: 2>, scalar_prefetch = 0 : i64, scratch_operands = 0 : i64, tpu.core_type = #tpu.core_type<tc>, window_params = [{transform_indices = @transform_0, window_bounds = array<i64: 64, 16>}, {pipeline_mode = #tpu.pipeline_mode<synchronous>, transform_indices = @transform_1, window_bounds = array<i64: 16, 32>}, {pipeline_mode = #tpu.pipeline_mode<synchronous>, transform_indices = @transform_2, window_bounds = array<i64: 4, 32, 16>}, {transform_indices = @transform_3, window_bounds = array<i64: 4, 32, 32>}]} {
    %c0 = arith.constant 0 : index
    %c0_0 = arith.constant 0 : index
    %0 = vector.load %arg1[%c0, %c0_0] : memref<64x16xf32, #tpu.memory_space<vmem>>, vector<64x16xf32>
    %c0_1 = arith.constant 0 : index
    %c0_2 = arith.constant 0 : index
    %1 = vector.load %arg2[%c0_1, %c0_2] : memref<16x32xf32, #tpu.memory_space<vmem>>, vector<16x32xf32>
    %cst = arith.constant dense<0.000000e+00> : vector<64x32xf32>
    %2 = tpu.matmul %0, %1, %cst {dimension_numbers = #tpu.dot_dimension_numbers<[1], [0], [0], [1], [0, 0, 1, 1], [], []>} : vector<64x16xf32>, vector<16x32xf32>, vector<64x32xf32> -> vector<64x32xf32>
    %3 = vector.shape_cast %2 : vector<64x32xf32> to vector<4x16x32xf32>
    %c0_3 = arith.constant 0 : index
    %c0_4 = arith.constant 0 : index
    %c0_5 = arith.constant 0 : index
    %4 = vector.load %arg3[%c0_3, %c0_4, %c0_5] : memref<4x32x16xf32, #tpu.memory_space<vmem>>, vector<4x32x16xf32>
    "tpu.trace_start"() <{level = 10 : i32, message = "boh,bhk->bok"}> : () -> ()
    %cst_6 = arith.constant dense<0.000000e+00> : vector<4x32x32xf32>
    %5 = tpu.matmul %4, %3, %cst_6 {dimension_numbers = #tpu.dot_dimension_numbers<[2], [1], [1], [2], [0, 0, 0, 1, 1, 2], [0], [0]>} : vector<4x32x16xf32>, vector<4x16x32xf32>, vector<4x32x32xf32> -> vector<4x32x32xf32>
    "tpu.trace_stop"() : () -> ()
    %c0_7 = arith.constant 0 : index
    %c0_8 = arith.constant 0 : index
    %c0_9 = arith.constant 0 : index
    %6 = vector.load %arg4[%c0_7, %c0_8, %c0_9] : memref<4x32x32xf32, #tpu.memory_space<vmem>>, vector<4x32x32xf32>
    tpu.vector_store %arg4[%c0_7, %c0_8, %c0_9], %5 {strides = array<i32>} : memref<4x32x32xf32, #tpu.memory_space<vmem>>, vector<4x32x32xf32>,
    return
  }
  func.func @transform_0(%arg0: i32) -> (i32, i32) {
    %c0_i32 = arith.constant 0 : i32
    %c0_i32_0 = arith.constant 0 : i32
    return %arg0, %c0_i32 : i32, i32
  }
  func.func @transform_1(%arg0: i32) -> (i32, i32) {
    %c0_i32 = arith.constant 0 : i32
    %c0_i32_0 = arith.constant 0 : i32
    %c0_i32_1 = arith.constant 0 : i32
    return %c0_i32, %c0_i32_0 : i32, i32
  }
  func.func @transform_2(%arg0: i32) -> (i32, i32, i32) {
    %c0_i32 = arith.constant 0 : i32
    %c0_i32_0 = arith.constant 0 : i32
    %c0_i32_1 = arith.constant 0 : i32
    %c0_i32_2 = arith.constant 0 : i32
    return %c0_i32, %c0_i32_0, %c0_i32_1 : i32, i32, i32
  }
  func.func @transform_3(%arg0: i32) -> (i32, i32, i32) {
    %c0_i32 = arith.constant 0 : i32
    %c0_i32_0 = arith.constant 0 : i32
    %c0_i32_1 = arith.constant 0 : i32
    return %arg0, %c0_i32, %c0_i32_0 : i32, i32, i32
  }
}

</mosaic_0001>

<bundles_post_ra>
// kernel: tpu_custom_call.1
= control target key start
LH: loop header
LB: loop body
LE: loop exit
PB: predicated region body
PF: predicated region fallthrough
CT: control target
= control target key end

     0   :  { %8 = vsyncpa [#allocation3], 0  ;;  %s895_s0 = inlined_call_operand.vmem [shape: f32[128,16], index: 0, kind: input, shape index: {}]   ;;  %s896_s1 = inlined_call_operand.vmem [shape: f32[16,32], index: 1, kind: input, shape index: {}]   ;;  %s897_s2 = inlined_call_operand.vmem [shape: f32[4,32,16], index: 2, kind: input, shape index: {}]   ;;  %s898_s3 = inlined_call_operand.hbm [shape: f32[8,32,32], index: 3, kind: output, shape index: {}]  }
   0x1   :  { %10 = vsyncpa [#allocation3 + $0x1], 0  ;;  %s694_s12 = smov 0   ;;  %s696_s13 = smov 0  }
   0x2   :  { %s698_s14 = smov 0   ;;  %s700_s15 = smov 0  }
   0x3 LB: > { %s715_s16 = sadd.s32 4294967295, %s670_s15   ;;  %s524_s17 = sadd.s32 4294967294, %s670_s15   ;;  %s670_s15 = sphi %s700_s15, %s904_s15   ;;  %s666_s14 = sphi %s698_s14, %s903_s14   ;;  %s662_s13 = sphi %s696_s13, %s902_s13   ;;  %s658_s12 = sphi %s694_s12, %s901_s12  }
   0x4   : > { %s719_s18 = sadd.s32 1, %s670_s15   ;;  %s91_s19 = sadd.s32 1, %s666_s14 }
   0x5   : > { %s88_s20 = ssub.s32 %s670_s15, %s719_s18  ;;  %p101_p0 = scmp.ne.s32.totalorder %s666_s14, %s662_s13 }
   0x6   : > { %p89_p1 = scmp.eq.s32.totalorder %s88_s20, 0  ;;  %p102_p2 = scmp.eq.s32.totalorder %s715_s16, 1 }
   0x7   : > { %p107_p3 = scmp.ne.s32.totalorder %s662_s13, %s658_s12  ;;  %p108_p4 = scmp.eq.s32.totalorder %s524_s17, 1 }
   0x8   : > { %s730_s21 = scalar_select %p89_p1, %s666_s14, %s91_s19  }
   0x9   : > { %p732_p5 = por %p102_p2, %p101_p0  ;;  %p736_p6 = por %p108_p4, %p107_p3 }
   0xa   : > { %p527_p7 = scmp.ge.s32.totalorder %s670_s15, 1  ;;  %p141_p8 = scmp.lt.s32.totalorder %s670_s15, 3 }
   0xc   : > { %p142_p9 = pnand %p527_p7, %p141_p8 }
   0xd   : > { %s529_s28 = sshll.u32 (!%p142_p9), %s715_s16, 3  ;;  %s628_s24 = scalar_lea.hbm (!%p142_p9), %s898_s3, 256 }
   0xe   : > { %145 = sbr.rel (%p142_p9) target bundleno = 352 (0x160), region = 32  ;;  %p166_p10 = scmp.lt.s32.totalorder (!%p142_p9), %s529_s28, 15 }
  0x13   : > { %v181_v0 = vld [vmem:[%s896_s1 + $0x8] sm:$0xff]  ;;  %v180_v1 = vld [vmem:[%s896_s1] sm:$0xff]  ;;  %s906_s28 = smov (!%p166_p10, %s529_s28), 15  ;;  %vm182_vm0 = vcmask 130048   ;;  %v250_v13 = vld [vmem:[%s897_s2 + $0x10] sm:$0xff]  ;;  %vm428_vm1 = vcmask 261120  }
  0x14   : > { %221 = vmatpush.msra.mxu0 %v181_v0  ;;  %563 = vmatpush.msra.mxu2 %v181_v0  ;;  %s530_s29 = sshll.u32 %s906_s28, 3  ;;  %v248_v14 = vld [vmem:[%s897_s2] sm:$0xff]  ;;  %v251_v17 = vld [vmem:[%s897_s2 + $0x18] sm:$0xff]  ;;  %v249_v18 = vld [vmem:[%s897_s2 + $0x8] sm:$0xff] }
  0x15   : > { %s169_s5 = scalar_lea.vmem %s895_s0, %s530_s29  ;;  %v252_v20 = vld [vmem:[%s897_s2 + $0x20] sm:$0xff]  ;;  %v253_v23 = vld [vmem:[%s897_s2 + $0x28] sm:$0xff]  ;;  %v254_v27 = vld [vmem:[%s897_s2 + $0x30] sm:$0xff]  ;;  %s162_s29 = sand.u32 1, %s662_s13  }
  0x16   : > { %222 = vmatpush.msra.mxu0 %v180_v1  ;;  %564 = vmatpush.msra.mxu2 %v180_v1  ;;  %v172_v2 = vld [vmem:[%s169_s5] sm:$0xff]  ;;  %v178_v3 = vld [vmem:[%s169_s5 + $0x30] sm:$0xff]  ;;  %v173_v4 = vld [vmem:[%s169_s5 + $0x8] sm:$0xff]  ;;  %s528_s30 = sshll.u32 %s162_s29, 7  ;;  %s446_s11 = scalar_lea.sflag [#allocation3], %s162_s29 }
  0x17   : > { %531 = vmatmul.msk.f32.vlgmr.msra.gmra.mxu0 %vm182_vm0, %v172_v2  ;;  %537 = vmatmul.msk.f32.vlgmr.msra.gmra.mxu2 %vm182_vm0, %v178_v3  ;;  %v179_v5 = vld [vmem:[%s169_s5 + $0x38] sm:$0xff]  ;;  %v174_v6 = vld [vmem:[%s169_s5 + $0x10] sm:$0xff]  ;;  %v176_v8 = vld [vmem:[%s169_s5 + $0x20] sm:$0xff]  ;;  %s827_s4 = scalar_lea.vmem [#allocation2], %s528_s30 }
  0x18   : > { %v175_v7 = vld [vmem:[%s169_s5 + $0x18] sm:$0xff]  ;;  %v177_v9 = vld [vmem:[%s169_s5 + $0x28] sm:$0xff]  ;;  %v260_v21 = vld [vmem:[%s897_s2 + $0x60] sm:$0xff]  ;;  %s562_s5 = sshll.u32 %s715_s16, 7  ;;  %s459_s9 = sshll.u32 %s827_s4, 4  ;;  %s460_s9 = int_to_ptr.vmem [resolvable:$true] %s459_s9 }
  0x19   : > { %v261_v24 = vld [vmem:[%s897_s2 + $0x68] sm:$0xff]  ;;  %v256_v26 = vld [vmem:[%s897_s2 + $0x40] sm:$0xff]  ;;  %v262_v28 = vld [vmem:[%s897_s2 + $0x70] sm:$0xff]  ;;  %s458_s8 = scalar_lea.hbm %s898_s3, %s562_s5 }
  0x1a   : > { %v257_v29 = vld [vmem:[%s897_s2 + $0x48] sm:$0xff]  ;;  %v255_v30 = vld [vmem:[%s897_s2 + $0x38] sm:$0xff]  ;;  %v258_v32 = vld [vmem:[%s897_s2 + $0x50] sm:$0xff]  ;;  %s461_s10 = sshll.u32 %s458_s8, 4  ;;  %s462_s10 = int_to_ptr.hbm [resolvable:$true] %s461_s10 }
  0x1b   : > { %v263_v31 = vld [vmem:[%s897_s2 + $0x78] sm:$0xff]  ;;  %s622_s17 = sshra.s32 %s462_s10, 4  ;;  %s623_s17 = int_to_ptr.hbm [resolvable:$true] %s622_s17 }
  0x1c   : > { %v259_v33 = vld [vmem:[%s897_s2 + $0x58] sm:$0xff]  ;;  %s624_s19 = scalar_lea.hbm %s623_s17, 128  ;;  %p629_p0 = scmp.lt.s32.totalorder %s623_s17, %s898_s3 }
  0x1d   : > { %p625_p11 = scmp.ne.s32.totalorder %s623_s17, %s624_s19  ;;  %p630_p1 = scmp.lt.s32.totalorder %s628_s24, %s624_s19 }
  0x1f   : > { %532 = vmatmul.msk.f32.gmra.mxu0 %vm182_vm0, %v173_v4  ;;  %538 = vmatmul.msk.f32.gmra.mxu2 %vm182_vm0, %v179_v5  ;;  %p626_p12 = pnand %p625_p11, %p732_p5  ;;  %p631_p2 = por %p630_p1, %p629_p0 }
  0x21   : > { %p627_p13 = pneg %p626_p12 }
  0x23   : > { %p632_p3 = pnand %p631_p2, %p627_p13 }
  0x27   : > { %533 = vmatmul.msk.f32.gmra.mxu0 %vm182_vm0, %v174_v6 }
  0x2f   : > { %534 = vmatmul.msk.f32.gmra.mxu0 %vm182_vm0, %v175_v7 }
  0x37   : > { %535 = vmatmul.msk.f32.gmra.mxu0 %vm182_vm0, %v176_v8 }
  0x3f   : > { %536 = vmatmul.msk.f32.gmra.mxu0 %vm182_vm0, %v177_v9 }
  0x94   : > { %v224_v10 = vpop.f32.mrf.mxu0 }
  0x9a   : > { %v242_v11 = vpop.f32.mrf.mxu2 }
  0x9c   : > { %v227_v12 = vpop.f32.mrf.mxu0 }
  0x9d   : > { %290 = vmatpush.msra.mxu1 %v227_v12  ;;  %565 = vmatpush.msra.mxu3 %v227_v12 }
  0x9f   : > { %291 = vmatpush.msra.mxu1 %v224_v10  ;;  %566 = vmatpush.msra.mxu3 %v224_v10 }
  0xa0   : > { %541 = vmatmul.msk.f32.vlgmr.msra.gmra.mxu3 %vm182_vm0, %v250_v13  ;;  %539 = vmatmul.msk.f32.vlgmr.msra.gmra.mxu1 %vm182_vm0, %v248_v14 }
  0xa2   : > { %v245_v15 = vpop.f32.mrf.mxu2 }
  0xa3   : > { %413 = vmatpush.msrb.mxu1 %v245_v15 }
  0xa4   : > { %v230_v16 = vpop.f32.mrf.mxu0 }
  0xa5   : > { %414 = vmatpush.msrb.mxu1 %v242_v11 }
  0xa8   : > { %542 = vmatmul.msk.f32.gmra.mxu3 %vm182_vm0, %v251_v17  ;;  %540 = vmatmul.msk.f32.gmra.mxu1 %vm182_vm0, %v249_v18 }
  0xac   : > { %v233_v19 = vpop.f32.mrf.mxu0 }
  0xad   : > { %331 = vmatpush.msrb.mxu2 %v233_v19 }
  0xaf   : > { %332 = vmatpush.msrb.mxu2 %v230_v16 }
  0xb0   : > { %543 = vmatmul.msk.f32.vlgmr.msrb.gmra.mxu2 %vm182_vm0, %v252_v20  ;;  %551 = vmatmul.msk.f32.vlgmr.msrb.gmra.mxu1 %vm182_vm0, %v260_v21 }
  0xb4   : > { %v236_v22 = vpop.f32.mrf.mxu0 }
  0xb8   : > { %544 = vmatmul.msk.f32.gmra.mxu2 %vm182_vm0, %v253_v23  ;;  %552 = vmatmul.msk.f32.gmra.mxu1 %vm182_vm0, %v261_v24 }
  0xbc   : > { %v239_v25 = vpop.f32.mrf.mxu0 }
  0xbd   : > { %372 = vmatpush.msrb.mxu3 %v239_v25 }
  0xbf   : > { %373 = vmatpush.msrb.mxu3 %v236_v22 }
  0xc0   : > { %547 = vmatmul.msk.f32.vlgmr.msrb.gmra.mxu3 %vm182_vm0, %v256_v26  ;;  %545 = vmatmul.msk.f32.gmra.mxu2 %vm182_vm0, %v254_v27 }
  0xc1   : > { %553 = vmatmul.msk.f32.gmra.mxu1 %vm182_vm0, %v262_v28 }
  0xc8   : > { %548 = vmatmul.msk.f32.gmra.mxu3 %vm182_vm0, %v257_v29  ;;  %546 = vmatmul.msk.f32.gmra.mxu2 %vm182_vm0, %v255_v30 }
  0xc9   : > { %554 = vmatmul.msk.f32.gmra.mxu1 %vm182_vm0, %v263_v31 }
  0xd0   : > { %549 = vmatmul.msk.f32.gmra.mxu3 %vm182_vm0, %v258_v32 }
  0xd8   : > { %550 = vmatmul.msk.f32.gmra.mxu3 %vm182_vm0, %v259_v33 }
 0x11d   : > { %v293_v34 = vpop.f32.mrf.mxu1 }
 0x11e   : > { %429 = vst.msk [vmem:[%s827_s4] sm:$0xff] %vm428_vm1, %v293_v34 }
 0x123   : > { %v299_v35 = vpop.f32.mrf.mxu3 }
 0x124   : > { %431 = vst.msk [vmem:[%s827_s4 + $0x10] sm:$0xff] %vm428_vm1, %v299_v35 }
 0x125   : > { %v296_v36 = vpop.f32.mrf.mxu1 }
 0x126   : > { %430 = vst.msk [vmem:[%s827_s4 + $0x8] sm:$0xff] %vm428_vm1, %v296_v36 }
 0x12b   : > { %v302_v37 = vpop.f32.mrf.mxu3 }
 0x12c   : > { %432 = vst.msk [vmem:[%s827_s4 + $0x18] sm:$0xff] %vm428_vm1, %v302_v37 }
 0x12d   : > { %v416_v38 = vpop.f32.mrf.mxu1 }
 0x12e   : > { %441 = vst.msk [vmem:[%s827_s4 + $0x60] sm:$0xff] %vm428_vm1, %v416_v38 }
 0x133   : > { %v334_v39 = vpop.f32.mrf.mxu2 }
 0x134   : > { %433 = vst.msk [vmem:[%s827_s4 + $0x20] sm:$0xff] %vm428_vm1, %v334_v39 }
 0x135   : > { %v419_v40 = vpop.f32.mrf.mxu1 }
 0x136   : > { %442 = vst.msk [vmem:[%s827_s4 + $0x68] sm:$0xff] %vm428_vm1, %v419_v40 }
 0x13b   : > { %v337_v41 = vpop.f32.mrf.mxu2 }
 0x13c   : > { %434 = vst.msk [vmem:[%s827_s4 + $0x28] sm:$0xff] %vm428_vm1, %v337_v41 }
 0x13e   : > { %v422_v42 = vpop.f32.mrf.mxu1 }
 0x13f   : > { %443 = vst.msk [vmem:[%s827_s4 + $0x70] sm:$0xff] %vm428_vm1, %v422_v42 }
 0x143   : > { %v375_v43 = vpop.f32.mrf.mxu3  ;;  %v340_v44 = vpop.f32.mrf.mxu2 }
 0x144   : > { %437 = vst.msk [vmem:[%s827_s4 + $0x40] sm:$0xff] %vm428_vm1, %v375_v43 }
 0x145   : > { %435 = vst.msk [vmem:[%s827_s4 + $0x30] sm:$0xff] %vm428_vm1, %v340_v44 }
 0x146   : > { %v425_v45 = vpop.f32.mrf.mxu1 }
 0x147   : > { %444 = vst.msk [vmem:[%s827_s4 + $0x78] sm:$0xff] %vm428_vm1, %v425_v45 }
 0x14b   : > { %v378_v46 = vpop.f32.mrf.mxu3  ;;  %v343_v47 = vpop.f32.mrf.mxu2 }
 0x14c   : > { %438 = vst.msk [vmem:[%s827_s4 + $0x48] sm:$0xff] %vm428_vm1, %v378_v46 }
 0x14d   : > { %436 = vst.msk [vmem:[%s827_s4 + $0x38] sm:$0xff] %vm428_vm1, %v343_v47 }
 0x153   : > { %v381_v48 = vpop.f32.mrf.mxu3 }
 0x154   : > { %439 = vst.msk [vmem:[%s827_s4 + $0x50] sm:$0xff] %vm428_vm1, %v381_v48 }
 0x15b   : > { %v384_v49 = vpop.f32.mrf.mxu3 }
 0x15c   : > { %440 = vst.msk [vmem:[%s827_s4 + $0x58] sm:$0xff] %vm428_vm1, %v384_v49 }
 0x15d   : > { %635 = shalt.err (!%p632_p3)
}
 0x15e   : > { %s672_s27 = smov 128   ;;  %s673_s28 = smov 8  }
 0x15f   : > { %567 = dma.vmem_to_hbm [thread:$0]  (%p732_p5), %s460_s9, 2048, %s462_s10, %s446_s11, %s672_s27, %s672_s27, %s673_s28  }
 0x160 PF: > { %p573_p4 = scmp.ge.s32.totalorder %s670_s15, 2  ;;  %s476_s29 = sand.u32 1, %s658_s12  }
 0x161   : > { %s477_s30 = scalar_lea.sflag [#allocation3], %s476_s29 }
 0x162   : > { %p570_p7 = pnand %p573_p4, %p736_p6 }
 0x164   : > { %p571_p8 = pneg %p570_p7 }
 0x166   : > { %653 = dma.done.wait (%p571_p8), %s477_s30, 2048  }
 0x167   : > { %655 = vsyncadd (%p571_p8), %s477_s30, 4294965248  ;;  %p13_p9 = scmp.ge.s32.totalorder %s719_s18, 4   ;;  %s901_s12 = smov %s662_s13 }
 0x168   : > { %s902_s13 = smov %s666_s14  ;;  %s903_s14 = smov %s730_s21 }
 0x169   : > { %s904_s15 = smov %s719_s18  ;;  %15 = sbr.rel (!%p13_p9) target bundleno = 3 (0x3), region = 67 }
 0x16e   :  { %483 = vsyncpa [#allocation3], 1 }
 0x16f   :  { %485 = vsyncpa [#allocation3 + $0x1], 1 }

</bundles_post_ra>
